<compile_context>
chip_gen: v7x
topology: tpu7x:2x2x1
jax: 0.10.0
libtpu: 0.0.40
codegen_flags: <defaults>
</compile_context>

<pallas_src>
import jax
import jax.numpy as jnp
from jax.experimental import pallas as pl
from jax.experimental.pallas import tpu as pltpu


def _round_up(x: int, m: int) -> int:
    return ((x + m - 1) // m) * m


def linear_kernel(params_ref, xt_ref, o_ref):
    # params_ref: SMEM (4,) f32 = [w0, w1, w2, bias]
    # xt_ref:     VMEM (3, TB)  x transposed (batch on the lane axis)
    # o_ref:      VMEM (1, TB)  lane-dense output tile
    w0 = params_ref[0]
    w1 = params_ref[1]
    w2 = params_ref[2]
    bias = params_ref[3]
    # Pure VPU: three scalar*vector FMAs + bias, full 128-lane utilization.
    o_ref[...] = (
        xt_ref[0:1, :] * w0
        + xt_ref[1:2, :] * w1
        + xt_ref[2:3, :] * w2
        + bias
    )


def linear_forward(x, w, b, *, lane_tile: int = 4096):
    """y = x @ w.T + b for a Linear(3, 1), computed in a Pallas TPU kernel."""
    x = x.astype(jnp.float32)
    batch, in_f = x.shape
    out_f = w.shape[0]
    assert in_f == 3 and out_f == 1, "kernel is specialized to Linear(3, 1)"

    # Lane-dense layout: batch on the lane (last) axis, padded to the tile.
    tb = min(lane_tile, _round_up(batch, 128))      # lane tile (multiple of 128)
    padded = _round_up(batch, tb)

    xt = x.T                                        # (3, batch) — layout plumbing in XLA
    if padded != batch:
        xt = jnp.pad(xt, ((0, 0), (0, padded - batch)))

    # Pack weight row + bias into one tiny SMEM-resident scalar array.
    params = jnp.concatenate(
        [w.reshape(-1).astype(jnp.float32), b.reshape(-1).astype(jnp.float32)]
    )  # (4,)

    out = pl.pallas_call(
        linear_kernel,
        out_shape=jax.ShapeDtypeStruct((out_f, padded), jnp.float32),
        grid=(padded // tb,),
        in_specs=[
            pl.BlockSpec(memory_space=pltpu.MemorySpace.SMEM),   # params -> SMEM, no VMEM tile
            pl.BlockSpec((in_f, tb), lambda i: (0, i)),          # x^T lane tile
        ],
        out_specs=pl.BlockSpec((out_f, tb), lambda i: (0, i)),   # lane-dense output tile
        compiler_params=pltpu.CompilerParams(
            dimension_semantics=("parallel",),
        ),
    )(params, xt)

    # Back to PyTorch layout (batch, 1); drop lane padding.
    return out[:, :batch].T


if __name__ == "__main__":
    key = jax.random.PRNGKey(0)
    kx, kw, kb = jax.random.split(key, 3)

    batch, in_features, out_features = 8, 3, 1

    # Deterministic synthetic parameters (PyTorch-style uniform init bound 1/sqrt(in)).
    bound = 1.0 / jnp.sqrt(jnp.float32(in_features))
    x = jax.random.normal(kx, (batch, in_features), dtype=jnp.float32)
    w = jax.random.uniform(kw, (out_features, in_features), jnp.float32, -bound, bound)
    b = jax.random.uniform(kb, (out_features,), jnp.float32, -bound, bound)

    out = linear_forward(x, w, b)
    out = jax.block_until_ready(out)

    # Reference check in plain JAX.
    ref = x @ w.T + b
    assert out.shape == (batch, out_features)
    assert jnp.allclose(out, ref, atol=1e-5, rtol=1e-5)

    print("KERNEL_OK")
</pallas_src>

<mosaic_0001>
module attributes {stable_mosaic.version = 11 : i64} {
  func.func @linear_kernel(%arg0: i32, %arg1: memref<4xf32, #tpu.memory_space<smem>>, %arg2: memref<3x128xf32, #tpu.memory_space<vmem>>, %arg3: memref<1x128xf32, #tpu.memory_space<vmem>>) attributes {dimension_semantics = [#tpu.dimension_semantics<parallel>], iteration_bounds = array<i64: 1>, scalar_prefetch = 0 : i64, scratch_operands = 0 : i64, tpu.core_type = #tpu.core_type<tc>, window_params = [{transform_indices = @transform_0, window_bounds = array<i64: 4>}, {transform_indices = @transform_1, window_bounds = array<i64: 3, 128>}, {transform_indices = @transform_2, window_bounds = array<i64: 1, 128>}]} {
    %c0 = arith.constant 0 : index
    %0 = memref.load %arg1[%c0] : memref<4xf32, #tpu.memory_space<smem>>
    %c1 = arith.constant 1 : index
    %1 = memref.load %arg1[%c1] : memref<4xf32, #tpu.memory_space<smem>>
    %c2 = arith.constant 2 : index
    %2 = memref.load %arg1[%c2] : memref<4xf32, #tpu.memory_space<smem>>
    %c3 = arith.constant 3 : index
    %3 = memref.load %arg1[%c3] : memref<4xf32, #tpu.memory_space<smem>>
    %c0_0 = arith.constant 0 : index
    %c0_1 = arith.constant 0 : index
    %4 = vector.load %arg2[%c0_0, %c0_1] : memref<3x128xf32, #tpu.memory_space<vmem>>, vector<1x128xf32>
    %5 = vector.broadcast %0 : f32 to vector<1x128xf32>
    %6 = arith.mulf %4, %5 : vector<1x128xf32>
    %c1_2 = arith.constant 1 : index
    %c0_3 = arith.constant 0 : index
    %7 = vector.load %arg2[%c1_2, %c0_3] : memref<3x128xf32, #tpu.memory_space<vmem>>, vector<1x128xf32>
    %8 = vector.broadcast %1 : f32 to vector<1x128xf32>
    %9 = arith.mulf %7, %8 : vector<1x128xf32>
    %10 = arith.addf %6, %9 : vector<1x128xf32>
    %c2_4 = arith.constant 2 : index
    %c0_5 = arith.constant 0 : index
    %11 = vector.load %arg2[%c2_4, %c0_5] : memref<3x128xf32, #tpu.memory_space<vmem>>, vector<1x128xf32>
    %12 = vector.broadcast %2 : f32 to vector<1x128xf32>
    %13 = arith.mulf %11, %12 : vector<1x128xf32>
    %14 = arith.addf %10, %13 : vector<1x128xf32>
    %15 = vector.broadcast %3 : f32 to vector<1x128xf32>
    %16 = arith.addf %14, %15 : vector<1x128xf32>
    %c0_6 = arith.constant 0 : index
    %c0_7 = arith.constant 0 : index
    %17 = vector.load %arg3[%c0_6, %c0_7] : memref<1x128xf32, #tpu.memory_space<vmem>>, vector<1x128xf32>
    tpu.vector_store %arg3[%c0_6, %c0_7], %16 {strides = array<i32>} : memref<1x128xf32, #tpu.memory_space<vmem>>, vector<1x128xf32>,
    return
  }
  func.func @transform_0(%arg0: i32) -> i32 {
    %c0_i32 = arith.constant 0 : i32
    %c0_i32_0 = arith.constant 0 : i32
    return %c0_i32 : i32
  }
  func.func @transform_1(%arg0: i32) -> (i32, i32) {
    %c0_i32 = arith.constant 0 : i32
    %c0_i32_0 = arith.constant 0 : i32
    return %c0_i32, %arg0 : i32, i32
  }
  func.func @transform_2(%arg0: i32) -> (i32, i32) {
    %c0_i32 = arith.constant 0 : i32
    %c0_i32_0 = arith.constant 0 : i32
    return %c0_i32, %arg0 : i32, i32
  }
}

</mosaic_0001>

<bundles_post_ra>
// kernel: tpu_custom_call.1
= control target key start
LH: loop header
LB: loop body
LE: loop exit
PB: predicated region body
PF: predicated region fallthrough
CT: control target
= control target key end

     0   :  { %7 = vsyncpa [#allocation5], 0  ;;  %s189_s0 = inlined_call_operand.hbm [shape: f32[4], index: 0, kind: input, shape index: {}]   ;;  %s190_s1 = inlined_call_operand.hbm [shape: f32[3,128], index: 1, kind: input, shape index: {}]   ;;  %s191_s2 = inlined_call_operand.hbm [shape: f32[1,128], index: 2, kind: output, shape index: {}]  }
   0x1   :  { %8 = vsyncpa [#allocation3], 0 }
   0x2   :  { %9 = vsyncpa [#allocation4], 0  ;;  %s75_s11 = scalar_lea.hbm %s189_s0, 16 }
   0x3   :  { %p76_p0 = scmp.ne.s32.totalorder %s189_s0, %s75_s11  ;;  %p79_p1 = scmp.lt.u32.totalorder %s75_s11, %s189_s0 }
   0x5   :  { %p81_p2 = pnand %p79_p1, %p76_p0 }
   0x7   :  { %84 = shalt.err (!%p81_p2)
}
   0x8   :  { %s135_s16 = smov [#allocation2]   ;;  %s136_s19 = smov [#allocation6]  }
   0x9   :  { %17 = dma.hbm_to_smem %s189_s0, 16, %s135_s16, [#allocation5]  }
   0xa   :  { %s24_s20 = sshll.u32 %s136_s19, 4  ;;  %s85_s23 = scalar_lea.hbm %s190_s1, 64  ;;  %s25_s20 = int_to_ptr.vmem [resolvable:$true] %s24_s20 }
   0xb   :  { %p86_p3 = scmp.ne.s32.totalorder %s190_s1, %s85_s23  ;;  %p89_p4 = scmp.lt.u32.totalorder %s85_s23, %s190_s1 }
   0xd   :  { %p91_p5 = pnand %p89_p4, %p86_p3 }
   0xf   :  { %94 = shalt.err (!%p91_p5)
}
  0x10   :  { %s95_s28 = scalar_lea.vmem %s25_s20, 64  ;;  %p100_p7 = scmp.lt.s32.totalorder %s25_s20, %s25_s20 }
  0x11   :  { %p96_p6 = scmp.ne.s32.totalorder %s25_s20, %s95_s28  ;;  %p101_p8 = scmp.lt.s32.totalorder %s95_s28, %s95_s28 }
  0x13   :  { %p102_p9 = por %p101_p8, %p100_p7 }
  0x15   :  { %p103_p10 = pnand %p102_p9, %p96_p6 }
  0x17   :  { %106 = shalt.err (!%p103_p10)
}
  0x18   :  { %27 = dma.hbm_to_vmem [thread:$0]  %s190_s1, 64, %s25_s20, [#allocation3]  }
  0x19   :  { %129 = dma.done.wait [#allocation5], 16  }
  0x1a   :  { %130 = vsyncadd [#allocation5], 4294967280 }
  0x1b   :  { %131 = dma.done.wait [#allocation3], 64  }
  0x1c   :  { %132 = vsyncadd [#allocation3], 4294967232 }
  0x1d   :  { %34 = sfence }
  0x1e   :  { %s35_s30 = sld [smem:[#allocation2]]  ;;  %s69_s3 = sld [smem:[#allocation2 + $0x1]]  ;;  %v39_v0 = vld [vmem:[#allocation6] sm:$0x1]  ;;  %v42_v1 = vld [vmem:[#allocation6 + $0x1] sm:$0x1] }
  0x1f   :  { %s70_s4 = sld [smem:[#allocation2 + $0x2]]  ;;  %s71_s5 = sld [smem:[#allocation2 + $0x3]]  ;;  %v46_v2 = vld [vmem:[#allocation6 + $0x2] sm:$0x1] }
  0x20   :  { %s137_s1 = smov [#allocation7]  }
  0x21   :  { %s59_s6 = sshll.u32 %s137_s1, 4  ;;  %s60_s6 = int_to_ptr.vmem [resolvable:$true] %s59_s6 }
  0x22   :  { %s107_s7 = scalar_lea.vmem %s60_s6, 16  ;;  %s111_s8 = scalar_lea.vmem %s60_s6, 32 }
  0x23   :  { %p108_p11 = scmp.ne.s32.totalorder %s60_s6, %s107_s7  ;;  %p112_p12 = scmp.lt.s32.totalorder %s60_s6, %s60_s6 }
  0x24   :  { %v40_v3 = vstv %s35_s30  ;;  %v43_v4 = vstv %s69_s3  ;;  %p113_p13 = scmp.lt.s32.totalorder %s111_s8, %s107_s7 }
  0x25   :  { %v41_v5 = vmul.f32 %v40_v3, %v39_v0  ;;  %v44_v6 = vmul.f32 %v43_v4, %v42_v1  ;;  %v47_v7 = vstv %s70_s4  ;;  %v50_v10 = vstv %s71_s5 }
  0x26   :  { %v48_v8 = vmul.f32 %v47_v7, %v46_v2  ;;  %p114_p0 = por %p113_p13, %p112_p12 }
  0x27   :  { %v45_v9 = vadd.f32 %v44_v6, %v41_v5 }
  0x28   :  { %p115_p1 = pnand %p114_p0, %p108_p11 }
  0x29   :  { %v49_v11 = vadd.f32 %v48_v8, %v45_v9 }
  0x2b   :  { %v51_v12 = vadd.f32 %v50_v10, %v49_v11 }
  0x2d   :  { %52 = vst [vmem:[#allocation7] sm:$0x1] %v51_v12 }
  0x2e   :  { %118 = shalt.err (!%p115_p1)
}
  0x2f   :  { %s119_s11 = scalar_lea.hbm %s191_s2, 16 }
  0x30   :  { %p120_p2 = scmp.ne.s32.totalorder %s191_s2, %s119_s11  ;;  %p123_p3 = scmp.lt.u32.totalorder %s119_s11, %s191_s2 }
  0x32   :  { %p125_p4 = pnand %p123_p3, %p120_p2 }
  0x34   :  { %128 = shalt.err (!%p125_p4)
}
  0x35   :  { %62 = dma.vmem_to_hbm [thread:$0]  %s60_s6, 16, %s191_s2, [#allocation4]  }
  0x36   :  { %133 = dma.done.wait [#allocation4], 16  }
  0x37   :  { %134 = vsyncadd [#allocation4], 4294967280 }
  0x38   :  { %66 = vsyncpa [#allocation3], 1 }
  0x39   :  { %67 = vsyncpa [#allocation4], 1 }
  0x3a   :  { %68 = vsyncpa [#allocation5], 1 }

</bundles_post_ra>
